<compile_context>
chip_gen: v6e
topology: v6e:2x2x1
jax: 0.10.0
libtpu: 0.0.40
codegen_flags: <defaults>
</compile_context>

<pallas_src>
import functools

import jax
import jax.numpy as jnp
from jax import lax
from jax.experimental import pallas as pl
from jax.experimental.pallas import tpu as pltpu

_LANE = 128
_SUBLANE = 8


def _round_up(x, m):
    return (x + m - 1) // m * m


# ---------------------------------------------------------------------------
# shared in-kernel compute
# ---------------------------------------------------------------------------
def _ln_relu(x, b, g, be, inv_n, lane_mask):
    """bias add + LayerNorm(eps=1e-5, affine) + ReLU over the REAL out_dim.

    Padded lanes (>= out_dim) carry exact zeros in x/b/g/be, so they stay zero
    and are excluded from the variance via `lane_mask` (two-pass statistics).
    """
    x = x + b
    mu = jnp.sum(x, axis=-1, keepdims=True) * inv_n
    xc = x - mu
    var = jnp.sum(jnp.where(lane_mask, xc * xc, 0.0), axis=-1, keepdims=True) * inv_n
    scale = g * lax.rsqrt(var + 1e-5)           # fold gamma into the scale
    return jnp.maximum(xc * scale + be, 0.0)


def _compute_info(a_ref, feat_ref, w11_ref, w23_ref, vecs_ref, wf_ref,
                  out_dim, mm_dtype):
    """info = wf0*h11 + wf1*h12 + wf2*h13 (accumulated incrementally)."""
    A = a_ref[...]                     # [N, N] (optionally bf16)
    vecs = vecs_ref[...]               # [9, Dp]: (b, gamma, beta) x 3 layers
    w23 = w23_ref[...]                 # [2*Dp, Dp]: W12 rows then W13 rows
    d = w23_ref.shape[1]               # padded out dim (multiple of 128)
    inv_n = 1.0 / out_dim              # LN statistics use the REAL out_dim
    lane_mask = lax.broadcasted_iota(jnp.int32, (1, d), 1) < out_dim

    # TODO(synk): nn.Dropout (p=0.4 on A, p=0.6 on activations) is treated as
    # identity (eval-mode numerics); torch training-mode RNG masks are not
    # reproduced.
    # TODO(synk): for large N, stream A row-blocks (BlockSpec(memory_space=
    # pl.ANY) + pltpu.emit_pipeline, bf16) instead of keeping the O(N^2)
    # operand VMEM-resident, and add a "parallel" row-block grid axis so both
    # v7x TensorCores are used.

    x = jnp.dot(feat_ref[...], w11_ref[...], preferred_element_type=jnp.float32)
    x = _ln_relu(x, vecs[0:1, :], vecs[1:2, :], vecs[2:3, :], inv_n, lane_mask)
    h = jnp.dot(A, x.astype(mm_dtype), preferred_element_type=jnp.float32)
    acc = wf_ref[0] * h                                            # hidden11

    x = jnp.dot(h, w23[:d, :], preferred_element_type=jnp.float32)
    x = _ln_relu(x, vecs[3:4, :], vecs[4:5, :], vecs[5:6, :], inv_n, lane_mask)
    h = jnp.dot(A, x.astype(mm_dtype), preferred_element_type=jnp.float32)
    acc = acc + wf_ref[1] * h                                      # hidden12

    x = jnp.dot(h, w23[d:, :], preferred_element_type=jnp.float32)
    x = _ln_relu(x, vecs[6:7, :], vecs[7:8, :], vecs[8:9, :], inv_n, lane_mask)
    h = jnp.dot(A, x.astype(mm_dtype), preferred_element_type=jnp.float32)
    acc = acc + wf_ref[2] * h                                      # hidden13
    return acc                                                     # [N, Dp]


# ---------------------------------------------------------------------------
# fused kernels (training / eval output heads)
# ---------------------------------------------------------------------------
def hetenet_train_kernel(out_dim, mm_dtype, obj_idx_ref, wf_ref, a_ref,
                         feat_ref, w11_ref, w23_ref, vecs_ref,
                         obj_out_ref, feat_out_ref):
    info = _compute_info(a_ref, feat_ref, w11_ref, w23_ref, vecs_ref, wf_ref,
                         out_dim, mm_dtype)
    n = info.shape[0]
    obj_num = n - feat_out_ref.shape[0]
    feat_out_ref[...] = info[obj_num:, :]          # static, sublane-aligned

    # Fused row gather as ONE MXU matmul: onehot[i, j] = (obj_index[i] == j).
    # Padded / out-of-range indices give all-zero rows (no OOB VMEM reads).
    sel = obj_idx_ref.shape[0]
    col_ids = lax.broadcasted_iota(jnp.int32, (sel, obj_num), 1)
    onehot = (obj_idx_ref[...] == col_ids).astype(jnp.float32)
    obj_out_ref[...] = jnp.dot(onehot, info[:obj_num, :],
                               preferred_element_type=jnp.float32)


def hetenet_eval_kernel(out_dim, mm_dtype, wf_ref, a_ref, feat_ref, w11_ref,
                        w23_ref, vecs_ref, objw_ref, drug_ref, feat_out_ref):
    info = _compute_info(a_ref, feat_ref, w11_ref, w23_ref, vecs_ref, wf_ref,
                         out_dim, mm_dtype)
    obj_num = objw_ref.shape[1]
    feat_out_ref[...] = info[obj_num:, :]
    # Normalize the weights BEFORE the matmul (divide off the epilogue tail).
    w = objw_ref[...]
    w = w * (1.0 / jnp.sum(w, axis=-1, keepdims=True))
    drug_ref[...] = jnp.dot(w, info[:obj_num, :],
                            preferred_element_type=jnp.float32)


# ---------------------------------------------------------------------------
# host-side wrappers
# ---------------------------------------------------------------------------
def hetenet_forward(packed, interactor_matrix, features, obj_index, obj_num,
                    training=True, matmul_dtype=jnp.float32):
    # TODO(synk): if many independent hetenet forwards are evaluated, batch
    # them behind one pallas_call with a leading "parallel" grid axis instead
    # of per-sample calls (amortizes launch/DMA latency, enables megacore).
    N = interactor_matrix.shape[0]
    feat_num = N - obj_num
    out_dim = packed["out_dim"]
    d_pad = packed["w23"].shape[1]
    in_pad = packed["w11"].shape[0]
    # NOTE: obj_num / feat_num should be multiples of 8 so the in-kernel row
    # split of `info` stays (8,128)-tile aligned; pad the graph if not.

    if features.shape[1] != in_pad:                 # lane-pad the input dim
        features = jnp.pad(features, ((0, 0), (0, in_pad - features.shape[1])))
    A = interactor_matrix.astype(matmul_dtype)
    features = features.astype(jnp.float32)

    vmem = pl.BlockSpec(memory_space=pltpu.MemorySpace.VMEM)
    smem = pl.BlockSpec(memory_space=pltpu.MemorySpace.SMEM)

    operands = (A, features, packed["w11"], packed["w23"], packed["vecs"])
    base_bytes = sum(int(a.size) * a.dtype.itemsize for a in operands)

    def _vmem_limit(out_rows):
        # Explicit VMEM budget: operands + outputs + live activations, with
        # 2x headroom, floored at 32 MiB and clamped to v7x's 64 MiB physical.
        total = base_bytes + (out_rows + N) * d_pad * 4
        return int(min(max(2 * total + (8 << 20), 32 << 20), 64 << 20))

    if training:
        # training branch: obj_index is an INTEGER index array
        assert jnp.issubdtype(obj_index.dtype, jnp.integer), (
            "training=True expects integer row indices")
        num_sel = int(obj_index.shape[0])
        sel_pad = _round_up(max(num_sel, 1), _SUBLANE)
        # pad with -1 so padded one-hot rows are all-zero
        idx = jnp.full((sel_pad, 1), -1, jnp.int32)
        idx = idx.at[:num_sel, 0].set(obj_index.astype(jnp.int32))

        kernel = functools.partial(hetenet_train_kernel, out_dim, matmul_dtype)
        obj_out, feat_out = pl.pallas_call(
            kernel,
            out_shape=(jax.ShapeDtypeStruct((sel_pad, d_pad), jnp.float32),
                       jax.ShapeDtypeStruct((feat_num, d_pad), jnp.float32)),
            in_specs=[vmem, smem,              # obj_index, weight_final
                      vmem, vmem,              # A, features
                      vmem, vmem, vmem],       # W11, W12||W13, b/g/be slab
            out_specs=(vmem, vmem),
            compiler_params=pltpu.CompilerParams(
                vmem_limit_bytes=_vmem_limit(sel_pad + feat_num)),
        )(idx, packed["weight_final"], *operands)
        return obj_out[:num_sel, :out_dim], feat_out[:, :out_dim]
    else:
        # eval branch: obj_index is a DENSE FLOAT weight vector over drugs
        assert jnp.issubdtype(obj_index.dtype, jnp.floating), (
            "training=False expects a dense float weight vector over drugs")
        objw = obj_index.reshape(1, obj_num).astype(jnp.float32)

        kernel = functools.partial(hetenet_eval_kernel, out_dim, matmul_dtype)
        drug, feat_out = pl.pallas_call(
            kernel,
            out_shape=(jax.ShapeDtypeStruct((1, d_pad), jnp.float32),
                       jax.ShapeDtypeStruct((feat_num, d_pad), jnp.float32)),
            in_specs=[smem,                    # weight_final
                      vmem, vmem,              # A, features
                      vmem, vmem, vmem,        # W11, W12||W13, b/g/be slab
                      vmem],                   # obj weight vector
            out_specs=(vmem, vmem),
            compiler_params=pltpu.CompilerParams(
                vmem_limit_bytes=_vmem_limit(1 + feat_num)),
        )(packed["weight_final"], *operands, objw)
        return drug[:, :out_dim], feat_out[:, :out_dim]


def pack_params(params):
    """Pack per-layer params into a few zero-padded, lane-dense slabs."""
    in_dim, out_dim = params["w11"].shape
    d_pad = _round_up(out_dim, _LANE)
    in_pad = _round_up(in_dim, _LANE)

    def pad2(a, rows, cols):
        return jnp.pad(a, ((0, rows - a.shape[0]), (0, cols - a.shape[1])))

    w12 = pad2(params["w12"], d_pad, d_pad)
    w13 = pad2(params["w13"], d_pad, d_pad)
    vec_names = [("b11", "g11", "be11"), ("b12", "g12", "be12"),
                 ("b13", "g13", "be13")]
    vecs = jnp.concatenate(
        [pad2(params[n], 1, d_pad) for grp in vec_names for n in grp], axis=0)
    return {
        "w11": pad2(params["w11"], in_pad, d_pad),
        "w23": jnp.concatenate([w12, w13], axis=0),
        "vecs": vecs,
        "weight_final": params["weight_final"],
        "out_dim": out_dim,
    }


def init_params(key, obj_num, feat_num, out_dim):
    """Deterministic synthetic parameters matching hetenet.__init__ shapes."""
    input_dim = obj_num + feat_num
    k11, k12, k13 = jax.random.split(key, 3)

    def linear(k, fan_in, fan_out):
        kw, kb = jax.random.split(k)
        bound = 1.0 / jnp.sqrt(jnp.float32(fan_in))
        # stored pre-transposed [in, out] for y = x @ W + b
        w = jax.random.uniform(kw, (fan_in, fan_out), jnp.float32, -bound, bound)
        b = jax.random.uniform(kb, (1, fan_out), jnp.float32, -bound, bound)
        return w, b

    w11, b11 = linear(k11, input_dim, out_dim)
    w12, b12 = linear(k12, out_dim, out_dim)
    w13, b13 = linear(k13, out_dim, out_dim)
    ones = jnp.ones((1, out_dim), jnp.float32)
    zeros = jnp.zeros((1, out_dim), jnp.float32)
    return {
        "w11": w11, "b11": b11, "g11": ones, "be11": zeros,
        "w12": w12, "b12": b12, "g12": ones, "be12": zeros,
        "w13": w13, "b13": b13, "g13": ones, "be13": zeros,
        "weight_final": jnp.array([0.5, 0.33, 0.25], jnp.float32),
    }


# ---------------------------------------------------------------------------
# pure-JAX reference (two-pass LayerNorm) for correctness checking
# ---------------------------------------------------------------------------
def hetenet_reference(params, A, features, obj_index, obj_num, training=True):
    def layer(x, w, b, g, be):
        x = x @ w + b
        mu = jnp.mean(x, -1, keepdims=True)
        var = jnp.mean((x - mu) ** 2, -1, keepdims=True)
        x = (x - mu) / jnp.sqrt(var + 1e-5) * g + be
        return jnp.maximum(x, 0.0)

    x = layer(features, params["w11"], params["b11"], params["g11"], params["be11"])
    h11 = A @ x
    x = layer(h11, params["w12"], params["b12"], params["g12"], params["be12"])
    h12 = A @ x
    x = layer(h12, params["w13"], params["b13"], params["g13"], params["be13"])
    h13 = A @ x
    wf = params["weight_final"]
    info = wf[0] * h11 + wf[1] * h12 + wf[2] * h13
    obj_info, feat_info = info[:obj_num], info[obj_num:]
    if training:
        return obj_info[obj_index], feat_info
    drug = (obj_index @ obj_info) / jnp.sum(obj_index)
    return drug.reshape(1, -1), feat_info


if __name__ == "__main__":
    obj_num, feat_num, out_dim = 8, 8, 32
    N = obj_num + feat_num  # 16; features dim == obj_num + feat_num == 16

    key = jax.random.PRNGKey(0)
    k_params, k_A, k_feat = jax.random.split(key, 3)

    params = init_params(k_params, obj_num, feat_num, out_dim)
    packed = pack_params(params)
    interactor_matrix = jax.random.uniform(k_A, (N, N), jnp.float32)
    features = jax.random.normal(k_feat, (N, obj_num + feat_num), jnp.float32)

    # ---- training path: one-hot MXU row gather fused into the kernel ----
    obj_index = jnp.array([0, 2, 5], dtype=jnp.int32)
    obj_out, feat_out = hetenet_forward(
        packed, interactor_matrix, features, obj_index, obj_num, training=True)
    jax.block_until_ready((obj_out, feat_out))
    assert obj_out.shape == (obj_index.shape[0], out_dim)
    assert feat_out.shape == (feat_num, out_dim)

    ref_obj, ref_feat = hetenet_reference(
        params, interactor_matrix, features, obj_index, obj_num, training=True)
    assert float(jnp.max(jnp.abs(obj_out - ref_obj))) < 1e-3
    assert float(jnp.max(jnp.abs(feat_out - ref_feat))) < 1e-3

    # ---- eval path: dense float weights over drugs, reduction fused ----
    obj_weights = jnp.array([1., 0., 1., 0., 0., 1., 0., 0.], jnp.float32)
    drug_out, feat_out2 = hetenet_forward(
        packed, interactor_matrix, features, obj_weights, obj_num, training=False)
    jax.block_until_ready((drug_out, feat_out2))
    assert drug_out.shape == (1, out_dim)

    ref_drug, ref_feat2 = hetenet_reference(
        params, interactor_matrix, features, obj_weights, obj_num, training=False)
    assert float(jnp.max(jnp.abs(drug_out - ref_drug))) < 1e-3
    assert float(jnp.max(jnp.abs(feat_out2 - ref_feat2))) < 1e-3

    print("KERNEL_OK")
</pallas_src>

<mosaic_0001>
module attributes {stable_mosaic.version = 11 : i64} {
  func.func @hetenet_train_kernel(%arg0: memref<8x1xi32, #tpu.memory_space<vmem>>, %arg1: memref<3xf32, #tpu.memory_space<smem>>, %arg2: memref<16x16xf32, #tpu.memory_space<vmem>>, %arg3: memref<16x128xf32, #tpu.memory_space<vmem>>, %arg4: memref<128x128xf32, #tpu.memory_space<vmem>>, %arg5: memref<256x128xf32, #tpu.memory_space<vmem>>, %arg6: memref<9x128xf32, #tpu.memory_space<vmem>>, %arg7: memref<8x128xf32, #tpu.memory_space<vmem>>, %arg8: memref<8x128xf32, #tpu.memory_space<vmem>>) attributes {dimension_semantics = [], scalar_prefetch = 0 : i64, scratch_operands = 0 : i64, tpu.core_type = #tpu.core_type<tc>} {
    %c0 = arith.constant 0 : index
    %c0_0 = arith.constant 0 : index
    %0 = vector.load %arg2[%c0, %c0_0] : memref<16x16xf32, #tpu.memory_space<vmem>>, vector<16x16xf32>
    %c0_1 = arith.constant 0 : index
    %c0_2 = arith.constant 0 : index
    %1 = vector.load %arg6[%c0_1, %c0_2] : memref<9x128xf32, #tpu.memory_space<vmem>>, vector<9x128xf32>
    %c0_3 = arith.constant 0 : index
    %c0_4 = arith.constant 0 : index
    %2 = vector.load %arg5[%c0_3, %c0_4] : memref<256x128xf32, #tpu.memory_space<vmem>>, vector<256x128xf32>
    %3 = tpu.iota {dimensions = array<i32: 1>} : vector<1x128xi32>
    %c32_i32 = arith.constant 32 : i32
    %4 = vector.broadcast %c32_i32 : i32 to vector<1x128xi32>
    %5 = arith.cmpi slt, %3, %4 : vector<1x128xi32>
    %c0_5 = arith.constant 0 : index
    %c0_6 = arith.constant 0 : index
    %6 = vector.load %arg3[%c0_5, %c0_6] : memref<16x128xf32, #tpu.memory_space<vmem>>, vector<16x128xf32>
    %c0_7 = arith.constant 0 : index
    %c0_8 = arith.constant 0 : index
    %7 = vector.load %arg4[%c0_7, %c0_8] : memref<128x128xf32, #tpu.memory_space<vmem>>, vector<128x128xf32>
    %cst = arith.constant dense<0.000000e+00> : vector<16x128xf32>
    %8 = tpu.matmul %6, %7, %cst {dimension_numbers = #tpu.dot_dimension_numbers<[1], [0], [0], [1], [0, 0, 1, 1], [], []>} : vector<16x128xf32>, vector<128x128xf32>, vector<16x128xf32> -> vector<16x128xf32>
    %9 = vector.extract_strided_slice %1 {offsets = [0, 0], sizes = [1, 128], strides = [1, 1]} : vector<9x128xf32> to vector<1x128xf32>
    %10 = vector.extract_strided_slice %1 {offsets = [1, 0], sizes = [1, 128], strides = [1, 1]} : vector<9x128xf32> to vector<1x128xf32>
    %11 = vector.extract_strided_slice %1 {offsets = [2, 0], sizes = [1, 128], strides = [1, 1]} : vector<9x128xf32> to vector<1x128xf32>
    %12 = vector.broadcast %9 : vector<1x128xf32> to vector<16x128xf32>
    %13 = arith.addf %8, %12 : vector<16x128xf32>
    %cst_9 = arith.constant dense<0.000000e+00> : vector<16xf32>
    %14 = vector.multi_reduction <add>, %13, %cst_9 [1] : vector<16x128xf32> to vector<16xf32>
    %15 = vector.shape_cast %14 : vector<16xf32> to vector<16x1xf32>
    %cst_10 = arith.constant 3.125000e-02 : f32
    %16 = vector.broadcast %cst_10 : f32 to vector<16x1xf32>
    %17 = arith.mulf %15, %16 : vector<16x1xf32>
    %18 = vector.broadcast %17 : vector<16x1xf32> to vector<16x128xf32>
    %19 = arith.subf %13, %18 : vector<16x128xf32>
    %20 = arith.mulf %19, %19 : vector<16x128xf32>
    %cst_11 = arith.constant 0.000000e+00 : f32
    %21 = vector.shape_cast %5 : vector<1x128xi1> to vector<1x128xi1>
    %22 = vector.broadcast %21 : vector<1x128xi1> to vector<16x128xi1>
    %23 = vector.broadcast %cst_11 : f32 to vector<16x128xf32>
    %24 = arith.select %22, %20, %23 : vector<16x128xi1>, vector<16x128xf32>
    %cst_12 = arith.constant dense<0.000000e+00> : vector<16xf32>
    %25 = vector.multi_reduction <add>, %24, %cst_12 [1] : vector<16x128xf32> to vector<16xf32>
    %26 = vector.shape_cast %25 : vector<16xf32> to vector<16x1xf32>
    %cst_13 = arith.constant 3.125000e-02 : f32
    %27 = vector.broadcast %cst_13 : f32 to vector<16x1xf32>
    %28 = arith.mulf %26, %27 : vector<16x1xf32>
    %cst_14 = arith.constant 9.99999974E-6 : f32
    %29 = vector.broadcast %cst_14 : f32 to vector<16x1xf32>
    %30 = arith.addf %28, %29 : vector<16x1xf32>
    %31 = math.rsqrt %30 : vector<16x1xf32>
    %32 = vector.broadcast %10 : vector<1x128xf32> to vector<16x128xf32>
    %33 = vector.broadcast %31 : vector<16x1xf32> to vector<16x128xf32>
    %34 = arith.mulf %32, %33 : vector<16x128xf32>
    %35 = arith.mulf %19, %34 : vector<16x128xf32>
    %36 = vector.broadcast %11 : vector<1x128xf32> to vector<16x128xf32>
    %37 = arith.addf %35, %36 : vector<16x128xf32>
    %cst_15 = arith.constant 0.000000e+00 : f32
    %38 = vector.broadcast %cst_15 : f32 to vector<16x128xf32>
    %39 = arith.maximumf %37, %38 : vector<16x128xf32>
    %cst_16 = arith.constant dense<0.000000e+00> : vector<16x128xf32>
    %40 = tpu.matmul %0, %39, %cst_16 {dimension_numbers = #tpu.dot_dimension_numbers<[1], [0], [0], [1], [0, 0, 1, 1], [], []>} : vector<16x16xf32>, vector<16x128xf32>, vector<16x128xf32> -> vector<16x128xf32>
    %c0_17 = arith.constant 0 : index
    %41 = memref.load %arg1[%c0_17] : memref<3xf32, #tpu.memory_space<smem>>
    %42 = vector.broadcast %41 : f32 to vector<16x128xf32>
    %43 = arith.mulf %42, %40 : vector<16x128xf32>
    %44 = vector.extract_strided_slice %2 {offsets = [0, 0], sizes = [128, 128], strides = [1, 1]} : vector<256x128xf32> to vector<128x128xf32>
    %cst_18 = arith.constant dense<0.000000e+00> : vector<16x128xf32>
    %45 = tpu.matmul %40, %44, %cst_18 {dimension_numbers = #tpu.dot_dimension_numbers<[1], [0], [0], [1], [0, 0, 1, 1], [], []>} : vector<16x128xf32>, vector<128x128xf32>, vector<16x128xf32> -> vector<16x128xf32>
    %46 = vector.extract_strided_slice %1 {offsets = [3, 0], sizes = [1, 128], strides = [1, 1]} : vector<9x128xf32> to vector<1x128xf32>
    %47 = vector.extract_strided_slice %1 {offsets = [4, 0], sizes = [1, 128], strides = [1, 1]} : vector<9x128xf32> to vector<1x128xf32>
    %48 = vector.extract_strided_slice %1 {offsets = [5, 0], sizes = [1, 128], strides = [1, 1]} : vector<9x128xf32> to vector<1x128xf32>
    %49 = vector.broadcast %46 : vector<1x128xf32> to vector<16x128xf32>
    %50 = arith.addf %45, %49 : vector<16x128xf32>
    %cst_19 = arith.constant dense<0.000000e+00> : vector<16xf32>
    %51 = vector.multi_reduction <add>, %50, %cst_19 [1] : vector<16x128xf32> to vector<16xf32>
    %52 = vector.shape_cast %51 : vector<16xf32> to vector<16x1xf32>
    %cst_20 = arith.constant 3.125000e-02 : f32
    %53 = vector.broadcast %cst_20 : f32 to vector<16x1xf32>
    %54 = arith.mulf %52, %53 : vector<16x1xf32>
    %55 = vector.broadcast %54 : vector<16x1xf32> to vector<16x128xf32>
    %56 = arith.subf %50, %55 : vector<16x128xf32>
    %57 = arith.mulf %56, %56 : vector<16x128xf32>
    %cst_21 = arith.constant 0.000000e+00 : f32
    %58 = vector.shape_cast %5 : vector<1x128xi1> to vector<1x128xi1>
    %59 = vector.broadcast %58 : vector<1x128xi1> to vector<16x128xi1>
    %60 = vector.broadcast %cst_21 : f32 to vector<16x128xf32>
    %61 = arith.select %59, %57, %60 : vector<16x128xi1>, vector<16x128xf32>
    %cst_22 = arith.constant dense<0.000000e+00> : vector<16xf32>
    %62 = vector.multi_reduction <add>, %61, %cst_22 [1] : vector<16x128xf32> to vector<16xf32>
    %63 = vector.shape_cast %62 : vector<16xf32> to vector<16x1xf32>
    %cst_23 = arith.constant 3.125000e-02 : f32
    %64 = vector.broadcast %cst_23 : f32 to vector<16x1xf32>
    %65 = arith.mulf %63, %64 : vector<16x1xf32>
    %cst_24 = arith.constant 9.99999974E-6 : f32
    %66 = vector.broadcast %cst_24 : f32 to vector<16x1xf32>
    %67 = arith.addf %65, %66 : vector<16x1xf32>
    %68 = math.rsqrt %67 : vector<16x1xf32>
    %69 = vector.broadcast %47 : vector<1x128xf32> to vector<16x128xf32>
    %70 = vector.broadcast %68 : vector<16x1xf32> to vector<16x128xf32>
    %71 = arith.mulf %69, %70 : vector<16x128xf32>
    %72 = arith.mulf %56, %71 : vector<16x128xf32>
    %73 = vector.broadcast %48 : vector<1x128xf32> to vector<16x128xf32>
    %74 = arith.addf %72, %73 : vector<16x128xf32>
    %cst_25 = arith.constant 0.000000e+00 : f32
    %75 = vector.broadcast %cst_25 : f32 to vector<16x128xf32>
    %76 = arith.maximumf %74, %75 : vector<16x128xf32>
    %cst_26 = arith.constant dense<0.000000e+00> : vector<16x128xf32>
    %77 = tpu.matmul %0, %76, %cst_26 {dimension_numbers = #tpu.dot_dimension_numbers<[1], [0], [0], [1], [0, 0, 1, 1], [], []>} : vector<16x16xf32>, vector<16x128xf32>, vector<16x128xf32> -> vector<16x128xf32>
    %c1 = arith.constant 1 : index
    %78 = memref.load %arg1[%c1] : memref<3xf32, #tpu.memory_space<smem>>
    %79 = vector.broadcast %78 : f32 to vector<16x128xf32>
    %80 = arith.mulf %79, %77 : vector<16x128xf32>
    %81 = arith.addf %43, %80 : vector<16x128xf32>
    %82 = vector.extract_strided_slice %2 {offsets = [128, 0], sizes = [128, 128], strides = [1, 1]} : vector<256x128xf32> to vector<128x128xf32>
    %cst_27 = arith.constant dense<0.000000e+00> : vector<16x128xf32>
    %83 = tpu.matmul %77, %82, %cst_27 {dimension_numbers = #tpu.dot_dimension_numbers<[1], [0], [0], [1], [0, 0, 1, 1], [], []>} : vector<16x128xf32>, vector<128x128xf32>, vector<16x128xf32> -> vector<16x128xf32>
    %84 = vector.extract_strided_slice %1 {offsets = [6, 0], sizes = [1, 128], strides = [1, 1]} : vector<9x128xf32> to vector<1x128xf32>
    %85 = vector.extract_strided_slice %1 {offsets = [7, 0], sizes = [1, 128], strides = [1, 1]} : vector<9x128xf32> to vector<1x128xf32>
    %86 = vector.extract_strided_slice %1 {offsets = [8, 0], sizes = [1, 128], strides = [1, 1]} : vector<9x128xf32> to vector<1x128xf32>
    %87 = vector.broadcast %84 : vector<1x128xf32> to vector<16x128xf32>
    %88 = arith.addf %83, %87 : vector<16x128xf32>
    %cst_28 = arith.constant dense<0.000000e+00> : vector<16xf32>
    %89 = vector.multi_reduction <add>, %88, %cst_28 [1] : vector<16x128xf32> to vector<16xf32>
    %90 = vector.shape_cast %89 : vector<16xf32> to vector<16x1xf32>
    %cst_29 = arith.constant 3.125000e-02 : f32
    %91 = vector.broadcast %cst_29 : f32 to vector<16x1xf32>
    %92 = arith.mulf %90, %91 : vector<16x1xf32>
    %93 = vector.broadcast %92 : vector<16x1xf32> to vector<16x128xf32>
    %94 = arith.subf %88, %93 : vector<16x128xf32>
    %95 = arith.mulf %94, %94 : vector<16x128xf32>
    %cst_30 = arith.constant 0.000000e+00 : f32
    %96 = vector.shape_cast %5 : vector<1x128xi1> to vector<1x128xi1>
    %97 = vector.broadcast %96 : vector<1x128xi1> to vector<16x128xi1>
    %98 = vector.broadcast %cst_30 : f32 to vector<16x128xf32>
    %99 = arith.select %97, %95, %98 : vector<16x128xi1>, vector<16x128xf32>
    %cst_31 = arith.constant dense<0.000000e+00> : vector<16xf32>
    %100 = vector.multi_reduction <add>, %99, %cst_31 [1] : vector<16x128xf32> to vector<16xf32>
    %101 = vector.shape_cast %100 : vector<16xf32> to vector<16x1xf32>
    %cst_32 = arith.constant 3.125000e-02 : f32
    %102 = vector.broadcast %cst_32 : f32 to vector<16x1xf32>
    %103 = arith.mulf %101, %102 : vector<16x1xf32>
    %cst_33 = arith.constant 9.99999974E-6 : f32
    %104 = vector.broadcast %cst_33 : f32 to vector<16x1xf32>
    %105 = arith.addf %103, %104 : vector<16x1xf32>
    %106 = math.rsqrt %105 : vector<16x1xf32>
    %107 = vector.broadcast %85 : vector<1x128xf32> to vector<16x128xf32>
    %108 = vector.broadcast %106 : vector<16x1xf32> to vector<16x128xf32>
    %109 = arith.mulf %107, %108 : vector<16x128xf32>
    %110 = arith.mulf %94, %109 : vector<16x128xf32>
    %111 = vector.broadcast %86 : vector<1x128xf32> to vector<16x128xf32>
    %112 = arith.addf %110, %111 : vector<16x128xf32>
    %cst_34 = arith.constant 0.000000e+00 : f32
    %113 = vector.broadcast %cst_34 : f32 to vector<16x128xf32>
    %114 = arith.maximumf %112, %113 : vector<16x128xf32>
    %cst_35 = arith.constant dense<0.000000e+00> : vector<16x128xf32>
    %115 = tpu.matmul %0, %114, %cst_35 {dimension_numbers = #tpu.dot_dimension_numbers<[1], [0], [0], [1], [0, 0, 1, 1], [], []>} : vector<16x16xf32>, vector<16x128xf32>, vector<16x128xf32> -> vector<16x128xf32>
    %c2 = arith.constant 2 : index
    %116 = memref.load %arg1[%c2] : memref<3xf32, #tpu.memory_space<smem>>
    %117 = vector.broadcast %116 : f32 to vector<16x128xf32>
    %118 = arith.mulf %117, %115 : vector<16x128xf32>
    %119 = arith.addf %81, %118 : vector<16x128xf32>
    %120 = vector.extract_strided_slice %119 {offsets = [8, 0], sizes = [8, 128], strides = [1, 1]} : vector<16x128xf32> to vector<8x128xf32>
    %c0_36 = arith.constant 0 : index
    %c0_37 = arith.constant 0 : index
    %121 = vector.load %arg8[%c0_36, %c0_37] : memref<8x128xf32, #tpu.memory_space<vmem>>, vector<8x128xf32>
    tpu.vector_store %arg8[%c0_36, %c0_37], %120 {strides = array<i32>} : memref<8x128xf32, #tpu.memory_space<vmem>>, vector<8x128xf32>,
    %122 = tpu.iota {dimensions = array<i32: 1>} : vector<8x8xi32>
    %c0_38 = arith.constant 0 : index
    %c0_39 = arith.constant 0 : index
    %123 = vector.load %arg0[%c0_38, %c0_39] : memref<8x1xi32, #tpu.memory_space<vmem>>, vector<8x1xi32>
    %124 = vector.broadcast %123 : vector<8x1xi32> to vector<8x8xi32>
    %125 = arith.cmpi eq, %124, %122 : vector<8x8xi32>
    %126 = arith.extui %125 : vector<8x8xi1> to vector<8x8xi32>
    %127 = arith.sitofp %126 : vector<8x8xi32> to vector<8x8xf32>
    %128 = vector.extract_strided_slice %119 {offsets = [0, 0], sizes = [8, 128], strides = [1, 1]} : vector<16x128xf32> to vector<8x128xf32>
    %cst_40 = arith.constant dense<0.000000e+00> : vector<8x128xf32>
    %129 = tpu.matmul %127, %128, %cst_40 {dimension_numbers = #tpu.dot_dimension_numbers<[1], [0], [0], [1], [0, 0, 1, 1], [], []>} : vector<8x8xf32>, vector<8x128xf32>, vector<8x128xf32> -> vector<8x128xf32>
    %c0_41 = arith.constant 0 : index
    %c0_42 = arith.constant 0 : index
    %130 = vector.load %arg7[%c0_41, %c0_42] : memref<8x128xf32, #tpu.memory_space<vmem>>, vector<8x128xf32>
    tpu.vector_store %arg7[%c0_41, %c0_42], %129 {strides = array<i32>} : memref<8x128xf32, #tpu.memory_space<vmem>>, vector<8x128xf32>,
    return
  }
}

</mosaic_0001>

<bundles_post_ra>
// kernel: tpu_custom_call.1
= control target key start
LH: loop header
LB: loop body
LE: loop exit
PB: predicated region body
PF: predicated region fallthrough
CT: control target
= control target key end

     0   :  { %14 = vsyncpa [#allocation5], 0  ;;  %s1436_s0 = inlined_call_operand.vmem [shape: s32[8,1], index: 0, kind: input, shape index: {}]   ;;  %s1437_s1 = inlined_call_operand.vmem [shape: f32[3], index: 1, kind: input, shape index: {}]   ;;  %s1438_s2 = inlined_call_operand.hbm [shape: f32[16,16], index: 2, kind: input, shape index: {}]   ;;  %s1439_s3 = inlined_call_operand.hbm [shape: f32[16,128], index: 3, kind: input, shape index: {}]   ;;  %s1440_s4 = inlined_call_operand.hbm [shape: f32[128,128], index: 4, kind: input, shape index: {}]   ;;  %s1441_s5 = inlined_call_operand.hbm [shape: f32[256,128], index: 5, kind: input, shape index: {}]   ;;  %s1442_s6 = inlined_call_operand.vmem [shape: f32[9,128], index: 6, kind: input, shape index: {}]   ;;  %s1443_s7 = inlined_call_operand.hbm [shape: f32[8,128], index: 7, kind: output, shape index: {0}]   ;;  %s1444_s8 = inlined_call_operand.hbm [shape: f32[8,128], index: 8, kind: output, shape index: {1}]  }
   0x1   :  { %15 = vsyncpa [#allocation3], 0 }
   0x2   :  { %16 = vsyncpa [#allocation8], 0 }
   0x3   :  { %17 = vsyncpa [#allocation11], 0 }
   0x4   :  { %18 = vsyncpa [#allocation4], 0 }
   0x5   :  { %19 = vsyncpa [#allocation14], 0  ;;  %s28_s29 = sshll.u32 %s1437_s1, 4  ;;  %s1250_s30 = smov [#allocation7]   ;;  %s29_s29 = int_to_ptr.vmem [resolvable:$true] %s28_s29 }
   0x6   :  { %s49_s9 = sshll.u32 %s1250_s30, 4  ;;  %s50_s9 = int_to_ptr.vmem [resolvable:$true] %s49_s9 }
   0x7   :  { %s1114_s10 = scalar_lea.vmem %s50_s9, 256  ;;  %p1119_p1 = scmp.lt.s32.totalorder %s50_s9, %s50_s9 }
   0x8   :  { %p1115_p0 = scmp.ne.s32.totalorder %s50_s9, %s1114_s10  ;;  %p1120_p2 = scmp.lt.s32.totalorder %s1114_s10, %s1114_s10 }
   0xa   :  { %p1121_p3 = por %p1120_p2, %p1119_p1 }
   0xc   :  { %p1122_p4 = pnand %p1121_p3, %p1115_p0 }
   0xe   :  { %1125 = shalt.err (!%p1122_p4)
}
   0xf   :  { %s1251_s11 = smov 128   ;;  %s1252_s12 = smov 8  }
  0x10   :  { %55 = dma.hbm_to_vmem [thread:$0]  %s1439_s3, 256, %s50_s9, [#allocation8], %s1251_s11, %s1251_s11, %s1252_s12  }
  0x11   :  { %s1126_s1 = scalar_lea.vmem %s29_s29, 16  ;;  %p1131_p6 = scmp.lt.s32.totalorder %s29_s29, %s29_s29 }
  0x12   :  { %p1127_p5 = scmp.ne.s32.totalorder %s29_s29, %s1126_s1  ;;  %p1132_p7 = scmp.lt.s32.totalorder %s1126_s1, %s1126_s1 }
  0x14   :  { %p1133_p8 = por %p1132_p7, %p1131_p6 }
  0x16   :  { %p1134_p9 = pnand %p1133_p8, %p1127_p5 }
  0x18   :  { %1137 = shalt.err (!%p1134_p9)
}
  0x19   :  { %s1253_s15 = smov [#allocation2]   ;;  %s1254_s16 = smov [#allocation6]  }
  0x1a   :  { %31 = dma.vmem_to_smem %s29_s29, 16, %s1253_s15, [#allocation5]  }
  0x1b   :  { %s37_s17 = sshll.u32 %s1254_s16, 4  ;;  %s1255_s18 = smov [#allocation9]   ;;  %s38_s17 = int_to_ptr.vmem [resolvable:$true] %s37_s17 }
  0x1c   :  { %s61_s19 = sshll.u32 %s1255_s18, 4  ;;  %s1146_s20 = scalar_lea.vmem %s38_s17, 256  ;;  %s62_s19 = int_to_ptr.vmem [resolvable:$true] %s61_s19 }
  0x1d   :  { %p1147_p10 = scmp.ne.s32.totalorder %s38_s17, %s1146_s20  ;;  %p1151_p11 = scmp.lt.s32.totalorder %s38_s17, %s38_s17 }
  0x1e   :  { %p1152_p12 = scmp.lt.s32.totalorder %s1146_s20, %s1146_s20 }
  0x20   :  { %p1153_p13 = por %p1152_p12, %p1151_p11 }
  0x22   :  { %p1154_p0 = pnand %p1153_p13, %p1147_p10 }
  0x24   :  { %1157 = shalt.err (!%p1154_p0)
}
  0x25   :  { %43 = dma.hbm_to_vmem [thread:$0]  %s1438_s2, 256, %s38_s17, [#allocation3], %s1251_s11, %s1251_s11, %s1252_s12  }
  0x26   :  { %s1166_s22 = scalar_lea.vmem %s62_s19, 2048  ;;  %p1171_p2 = scmp.lt.s32.totalorder %s62_s19, %s62_s19 }
  0x27   :  { %p1167_p1 = scmp.ne.s32.totalorder %s62_s19, %s1166_s22  ;;  %p1172_p3 = scmp.lt.s32.totalorder %s1166_s22, %s1166_s22 }
  0x29   :  { %p1173_p4 = por %p1172_p3, %p1171_p2 }
  0x2b   :  { %p1174_p5 = pnand %p1173_p4, %p1167_p1 }
  0x2d   :  { %1177 = shalt.err (!%p1174_p5)
}
  0x2e   :  { %67 = dma.hbm_to_vmem [thread:$0]  %s1440_s4, 2048, %s62_s19, [#allocation8], %s1251_s11, %s1251_s11, %s1252_s12  }
  0x2f   :  { %s1256_s25 = smov [#allocation10]  }
  0x30   :  { %s73_s26 = sshll.u32 %s1256_s25, 4  ;;  %s74_s26 = int_to_ptr.vmem [resolvable:$true] %s73_s26 }
  0x31   :  { %s1186_s27 = scalar_lea.vmem %s74_s26, 4096  ;;  %p1191_p7 = scmp.lt.s32.totalorder %s74_s26, %s74_s26 }
  0x32   :  { %p1187_p6 = scmp.ne.s32.totalorder %s74_s26, %s1186_s27  ;;  %p1192_p8 = scmp.lt.s32.totalorder %s1186_s27, %s1186_s27 }
  0x34   :  { %p1193_p9 = por %p1192_p8, %p1191_p7 }
  0x36   :  { %p1194_p10 = pnand %p1193_p9, %p1187_p6 }
  0x38   :  { %1197 = shalt.err (!%p1194_p10)
}
  0x39   :  { %79 = dma.hbm_to_vmem [thread:$0]  %s1441_s5, 4096, %s74_s26, [#allocation11], %s1251_s11, %s1251_s11, %s1252_s12  }
  0x3a   :  { %1238 = dma.done.wait [#allocation5], 16  }
  0x3b   :  { %1239 = vsyncadd [#allocation5], 4294967280 }
  0x3c   :  { %1240 = dma.done.wait [#allocation3], 256  }
  0x3d   :  { %1241 = vsyncadd [#allocation3], 4294967040 }
  0x3e   :  { %1242 = dma.done.wait [#allocation8], 2304  }
  0x3f   :  { %1243 = vsyncadd [#allocation8], 4294964992 }
  0x40   :  { %1244 = dma.done.wait [#allocation11], 4096  }
  0x41   :  { %1245 = vsyncadd [#allocation11], 4294963200 }
  0x42   :  { %97 = sfence }
  0x43   :  { %v154_v0 = vld [vmem:[#allocation9 + $0x78] sm:$0xff]  ;;  %v153_v1 = vld [vmem:[#allocation9 + $0x70] sm:$0xff]  ;;  %v152_v2 = vld [vmem:[#allocation9 + $0x68] sm:$0xff]  ;;  %v134_v18 = vlaneseq  ;;  %vm274_vm1 = vcmask 130048   ;;  %s1394_s29 = sld [smem:[#allocation2]]  ;;  %vm1259_vm2 = vmmov 0  }
  0x44   :  { %950 = vmatprep.subr.mxu0 %v154_v0  ;;  %v151_v3 = vld [vmem:[#allocation9 + $0x60] sm:$0xff]  ;;  %v137_v4 = vld [vmem:[#allocation7] sm:$0xff]  ;;  %v150_v5 = vld [vmem:[#allocation9 + $0x58] sm:$0xff]  ;;  %s1396_s30 = sld [smem:[#allocation2 + $0x1]]  ;;  %vm764_vm4 = vcmask 64512   ;;  %s1260_s12 = smov [#allocation13]  }
  0x45   :  { %951 = vmatpush3.msra.mxu0 %v154_v0  ;;  %982 = vmatprep.mubr.f32.mxu0 %v137_v4  ;;  %v149_v6 = vld [vmem:[#allocation9 + $0x50] sm:$0xff]  ;;  %v148_v7 = vld [vmem:[#allocation9 + $0x48] sm:$0xff]  ;;  %v147_v8 = vld [vmem:[#allocation9 + $0x40] sm:$0xff]  ;;  %v1334_v19 = vshrl.u32 %v134_v18, 7  ;;  %v1343_v28 = vand.u32 127, %v134_v18  ;;  %s855_s13 = sshll.u32 %s1260_s12, 4  ;;  %s856_s13 = int_to_ptr.vmem [resolvable:$true] %s855_s13 }
  0x46   :  { %952 = vmatprep.subr.mxu0 %v153_v1  ;;  %v146_v9 = vld [vmem:[#allocation9 + $0x38] sm:$0xff]  ;;  %v145_v10 = vld [vmem:[#allocation9 + $0x30] sm:$0xff]  ;;  %v144_v11 = vld [vmem:[#allocation9 + $0x28] sm:$0xff]  ;;  %s1198_s14 = scalar_lea.vmem %s856_s13, 128  ;;  %p1203_p12 = scmp.lt.s32.totalorder %s856_s13, %s856_s13 }
  0x47   :  { %953 = vmatpush3.msra.mxu0 %v153_v1  ;;  %v143_v12 = vld [vmem:[#allocation9 + $0x20] sm:$0xff]  ;;  %v142_v13 = vld [vmem:[#allocation9 + $0x18] sm:$0xff]  ;;  %v141_v14 = vld [vmem:[#allocation9 + $0x10] sm:$0xff]  ;;  %v157_v20 = vsub.s32 0, %v1334_v19  ;;  %vm136_vm0 = vcmp.lt.s32.totalorder %v1343_v28, 32  ;;  %v260_v45 = vsub.s32 1, %v1334_v19  ;;  %p1199_p11 = scmp.ne.s32.totalorder %s856_s13, %s1198_s14  ;;  %p1204_p13 = scmp.lt.s32.totalorder %s1198_s14, %s1198_s14 }
  0x48   :  { %954 = vmatprep.subr.mxu0 %v152_v2  ;;  %v140_v15 = vld [vmem:[#allocation9 + $0x8] sm:$0xff]  ;;  %v139_v16 = vld [vmem:[#allocation9] sm:$0xff]  ;;  %v138_v17 = vld [vmem:[#allocation7 + $0x8] sm:$0xff]  ;;  %v268_v47 = vsub.s32 2, %v1334_v19 }
  0x49   :  { %955 = vmatpush3.msra.mxu0 %v152_v2  ;;  %v1340_v21 = vld [vmem:[%s1442_s6] sm:$0xff]  ;;  %v1350_v38 = vld [vmem:[#allocation6] sm:$0xff]  ;;  %v1358_v59 = vld [vmem:[#allocation6 + $0x8] sm:$0xff]  ;;  %p1205_p0 = por %p1204_p13, %p1203_p12 }
  0x4a   :  { %956 = vmatprep.subr.mxu0 %v151_v3  ;;  %v158_v22 = vrot.slane %v1340_v21, %v157_v20  ;;  %989 = vmatprep.mubr.msk.f32.mxu1 %vm274_vm1, %v1350_v38  ;;  %v261_v46 = vrot.slane %v1340_v21, %v260_v45  ;;  %v269_v50 = vrot.slane %v1340_v21, %v268_v47  ;;  %v117_v60 = vld [vmem:[#allocation10 + $0x78] sm:$0xff]  ;;  %v116_v61 = vld [vmem:[#allocation10 + $0x70] sm:$0xff]  ;;  %v115_v62 = vld [vmem:[#allocation10 + $0x68] sm:$0xff] }
  0x4b   :  { %957 = vmatpush3.msra.mxu0 %v151_v3  ;;  %v114_v63 = vld [vmem:[#allocation10 + $0x60] sm:$0xff]  ;;  %v113_v0 = vld [vmem:[#allocation10 + $0x58] sm:$0xff]  ;;  %v112_v1 = vld [vmem:[#allocation10 + $0x50] sm:$0xff]  ;;  %p1206_p1 = pnand %p1205_p0, %p1199_p11 }
  0x4c   :  { %958 = vmatprep.subr.mxu0 %v150_v5  ;;  %v111_v2 = vld [vmem:[#allocation10 + $0x48] sm:$0xff]  ;;  %v110_v3 = vld [vmem:[#allocation10 + $0x40] sm:$0xff]  ;;  %v109_v4 = vld [vmem:[#allocation10 + $0x38] sm:$0xff] }
  0x4d   :  { %959 = vmatpush3.msra.mxu0 %v150_v5  ;;  %v108_v5 = vld [vmem:[#allocation10 + $0x30] sm:$0xff]  ;;  %v122_v45 = vld [vmem:[#allocation10 + $0xa0] sm:$0xff] }
  0x4e   :  { %960 = vmatprep.subr.mxu0 %v149_v6  ;;  %v120_v47 = vld [vmem:[#allocation10 + $0x90] sm:$0xff] }
  0x4f   :  { %961 = vmatpush3.msra.mxu0 %v149_v6  ;;  %v107_v6 = vld [vmem:[#allocation10 + $0x28] sm:$0xff] }
  0x50   :  { %962 = vmatprep.subr.mxu0 %v148_v7 }
  0x51   :  { %963 = vmatpush3.msra.mxu0 %v148_v7  ;;  %v106_v7 = vld [vmem:[#allocation10 + $0x20] sm:$0xff] }
  0x52   :  { %964 = vmatprep.subr.mxu0 %v147_v8 }
  0x53   :  { %965 = vmatpush3.msra.mxu0 %v147_v8  ;;  %v105_v8 = vld [vmem:[#allocation10 + $0x18] sm:$0xff] }
  0x54   :  { %966 = vmatprep.subr.mxu0 %v146_v9 }
  0x55   :  { %967 = vmatpush3.msra.mxu0 %v146_v9  ;;  %v104_v9 = vld [vmem:[#allocation10 + $0x10] sm:$0xff] }
  0x56   :  { %968 = vmatprep.subr.mxu0 %v145_v10 }
  0x57   :  { %969 = vmatpush3.msra.mxu0 %v145_v10  ;;  %v103_v10 = vld [vmem:[#allocation10 + $0x8] sm:$0xff] }
  0x58   :  { %970 = vmatprep.subr.mxu0 %v144_v11 }
  0x59   :  { %971 = vmatpush3.msra.mxu0 %v144_v11  ;;  %v102_v11 = vld [vmem:[#allocation10] sm:$0xff] }
  0x5a   :  { %972 = vmatprep.subr.mxu0 %v143_v12 }
  0x5b   :  { %973 = vmatpush3.msra.mxu0 %v143_v12 }
  0x5c   :  { %974 = vmatprep.subr.mxu0 %v142_v13 }
  0x5d   :  { %975 = vmatpush3.msra.mxu0 %v142_v13 }
  0x5e   :  { %976 = vmatprep.subr.mxu0 %v141_v14 }
  0x5f   :  { %977 = vmatpush3.msra.mxu0 %v141_v14  ;;  %v362_v14 = vsub.s32 3, %v1334_v19 }
  0x60   :  { %978 = vmatprep.subr.mxu0 %v140_v15 }
  0x61   :  { %979 = vmatpush3.msra.mxu0 %v140_v15  ;;  %v363_v15 = vrot.slane %v1340_v21, %v362_v14 }
  0x62   :  { %980 = vmatprep.subr.mxu0 %v139_v16 }
  0x63   :  { %981 = vmatpush3.msra.mxu0 %v139_v16 }
  0x64   :  { %983 = vmatmul.mubr.f32.vlgmr.msra.gmra.mxu0 %v138_v17 }
 0x124   :  { %v984_v23 = vpop.f32.mrf.mxu0 }
 0x125   :  { %v231_v24 = vadd.f32 %v984_v23, %v158_v22 }
 0x126   :  { %v225_v25 = vpop.f32.mrf.mxu0 }
 0x127   :  { %236 = vadd.xlane.f32.xlu0 %v231_v24  ;;  %v226_v26 = vadd.f32 %v225_v25, %v158_v22 }
 0x12b   :  { %234 = vadd.xlane.f32.xlu0 %v226_v26 }
 0x1b0   :  { %v237_v27 = vpop.xlane.xlu0 %236 }
 0x1b1   :  { %v239_v29 = vmul.f32 0.03125, %v237_v27 }
 0x1b3   :  { %v241_v30 = vsub.f32 %v231_v24, %v239_v29 }
 0x1b4   :  { %v235_v31 = vpop.xlane.xlu0 %234 }
 0x1b5   :  { %v238_v32 = vmul.f32 0.03125, %v235_v31  ;;  %v243_v33 = vmul.f32 %v241_v30, %v241_v30 }
 0x1b7   :  { %v240_v34 = vsub.f32 %v226_v26, %v238_v32  ;;  %v247_v35 = vsel %vm136_vm0, %v243_v33, 0.0  ;;  %v133_v33 = vld [vmem:[#allocation10 + $0xf8] sm:$0xff] }
 0x1b8   :  { %250 = vadd.xlane.f32.xlu1 %v247_v35  ;;  %1034 = vmatprep.subr.mxu0 %v133_v33  ;;  %v131_v35 = vld [vmem:[#allocation10 + $0xe8] sm:$0xff] }
 0x1b9   :  { %v242_v36 = vmul.f32 %v240_v34, %v240_v34  ;;  %1035 = vmatpush3.msra.mxu0 %v133_v33  ;;  %v757_v33 = vld [vmem:[%s1436_s0] sm:$0xff] }
 0x1bb   :  { %v246_v37 = vsel %vm136_vm0, %v242_v36, 0.0  ;;  %v130_v36 = vld [vmem:[#allocation10 + $0xe0] sm:$0xff] }
 0x1bc   :  { %248 = vadd.xlane.f32.xlu1 %v246_v37  ;;  %v129_v37 = vld [vmem:[#allocation10 + $0xd8] sm:$0xff] }
 0x241   :  { %v251_v39 = vpop.xlane.xlu1 %250 }
 0x242   :  { %v253_v40 = vmul.f32 0.03125, %v251_v39  ;;  %v128_v39 = vld [vmem:[#allocation10 + $0xd0] sm:$0xff] }
 0x244   :  { %v255_v41 = vadd.f32 1e-05, %v253_v40  ;;  %v127_v40 = vld [vmem:[#allocation10 + $0xc8] sm:$0xff] }
 0x245   :  { %v249_v42 = vpop.xlane.xlu1 %248 }
 0x246   :  { %1094 = vrsqrt.f32 %v255_v41  ;;  %v252_v43 = vmul.f32 0.03125, %v249_v42  ;;  %v126_v41 = vld [vmem:[#allocation10 + $0xc0] sm:$0xff]  ;;  %v125_v42 = vld [vmem:[#allocation10 + $0xb8] sm:$0xff] }
 0x248   :  { %v254_v44 = vadd.f32 1e-05, %v252_v43  ;;  %v124_v43 = vld [vmem:[#allocation10 + $0xb0] sm:$0xff] }
 0x24a   :  { %1096 = vrsqrt.f32 %v254_v44  ;;  %v123_v44 = vld [vmem:[#allocation10 + $0xa8] sm:$0xff] }
 0x253   :  { %v1095_v48 = vpop.eup %1094 }
 0x254   :  { %v263_v49 = vmul.f32 %v1095_v48, %v261_v46 }
 0x256   :  { %v265_v51 = vmul.f32 %v263_v49, %v241_v30 }
 0x257   :  { %v1097_v52 = vpop.eup %1096 }
 0x258   :  { %v271_v53 = vadd.f32 %v269_v50, %v265_v51  ;;  %v262_v54 = vmul.f32 %v1097_v52, %v261_v46  ;;  %v121_v46 = vld [vmem:[#allocation10 + $0x98] sm:$0xff] }
 0x25a   :  { %v273_v55 = vmax.f32 %v271_v53, 0.0  ;;  %v264_v56 = vmul.f32 %v262_v54, %v240_v34  ;;  %v132_v34 = vld [vmem:[#allocation10 + $0xf0] sm:$0xff]  ;;  %v463_v54 = vsub.s32 4, %v1334_v19 }
 0x25b   :  { %1036 = vmatprep.subr.mxu0 %v132_v34 }
 0x25c   :  { %985 = vmatprep.subr.mxu1 %v273_v55  ;;  %v270_v57 = vadd.f32 %v269_v50, %v264_v56  ;;  %1037 = vmatpush3.msra.mxu0 %v132_v34  ;;  %v471_v56 = vsub.s32 5, %v1334_v19  ;;  %v1257_v34 = vmov 0  }
 0x25d   :  { %986 = vmatpush3.msra.mxu1 %v273_v55  ;;  %1038 = vmatprep.subr.mxu0 %v131_v35  ;;  %v464_v55 = vrot.slane %v1340_v21, %v463_v54 }
 0x25e   :  { %v272_v58 = vmax.f32 %v270_v57, 0.0  ;;  %1039 = vmatpush3.msra.mxu0 %v131_v35  ;;  %1093 = vset.pattern.permute.xlu0 %v1257_v34 }
 0x25f   :  { %1040 = vmatprep.subr.mxu0 %v130_v36 }
 0x260   :  { %987 = vmatprep.subr.mxu1 %v272_v58  ;;  %1041 = vmatpush3.msra.mxu0 %v130_v36 }
 0x261   :  { %988 = vmatpush3.msra.mxu1 %v272_v58  ;;  %1042 = vmatprep.subr.mxu0 %v129_v37 }
 0x262   :  { %990 = vmatmul.mubr.msk.f32.vlgmr.msra.gmra.mxu1 %vm274_vm1, %v1358_v59  ;;  %992 = vmatprep.subr.mxu1 %v117_v60 }
 0x263   :  { %993 = vmatpush3.msra.mxu1 %v117_v60  ;;  %1043 = vmatpush3.msra.mxu0 %v129_v37  ;;  %v472_v60 = vrot.slane %v1340_v21, %v471_v56 }
 0x264   :  { %994 = vmatprep.subr.mxu1 %v116_v61  ;;  %1044 = vmatprep.subr.mxu0 %v128_v39 }
 0x265   :  { %995 = vmatpush3.msra.mxu1 %v116_v61  ;;  %1045 = vmatpush3.msra.mxu0 %v128_v39 }
 0x266   :  { %996 = vmatprep.subr.mxu1 %v115_v62  ;;  %1046 = vmatprep.subr.mxu0 %v127_v40 }
 0x267   :  { %997 = vmatpush3.msra.mxu1 %v115_v62  ;;  %1047 = vmatpush3.msra.mxu0 %v127_v40 }
 0x268   :  { %998 = vmatprep.subr.mxu1 %v114_v63  ;;  %1048 = vmatprep.subr.mxu0 %v126_v41 }
 0x269   :  { %999 = vmatpush3.msra.mxu1 %v114_v63  ;;  %1049 = vmatpush3.msra.mxu0 %v126_v41 }
 0x26a   :  { %1000 = vmatprep.subr.mxu1 %v113_v0  ;;  %1050 = vmatprep.subr.mxu0 %v125_v42 }
 0x26b   :  { %1001 = vmatpush3.msra.mxu1 %v113_v0  ;;  %1051 = vmatpush3.msra.mxu0 %v125_v42  ;;  %v661_v42 = vsub.s32 7, %v1334_v19 }
 0x26c   :  { %1002 = vmatprep.subr.mxu1 %v112_v1  ;;  %1052 = vmatprep.subr.mxu0 %v124_v43 }
 0x26d   :  { %1003 = vmatpush3.msra.mxu1 %v112_v1  ;;  %1053 = vmatpush3.msra.mxu0 %v124_v43  ;;  %v662_v43 = vrot.slane %v1340_v21, %v661_v42 }
 0x26e   :  { %1004 = vmatprep.subr.mxu1 %v111_v2  ;;  %1054 = vmatprep.subr.mxu0 %v123_v44 }
 0x26f   :  { %1005 = vmatpush3.msra.mxu1 %v111_v2  ;;  %1055 = vmatpush3.msra.mxu0 %v123_v44 }
 0x270   :  { %1006 = vmatprep.subr.mxu1 %v110_v3  ;;  %1056 = vmatprep.subr.mxu0 %v122_v45 }
 0x271   :  { %1007 = vmatpush3.msra.mxu1 %v110_v3  ;;  %1057 = vmatpush3.msra.mxu0 %v122_v45 }
 0x272   :  { %1008 = vmatprep.subr.mxu1 %v109_v4  ;;  %1058 = vmatprep.subr.mxu0 %v121_v46 }
 0x273   :  { %1009 = vmatpush3.msra.mxu1 %v109_v4  ;;  %1059 = vmatpush3.msra.mxu0 %v121_v46 }
 0x274   :  { %1010 = vmatprep.subr.mxu1 %v108_v5  ;;  %1060 = vmatprep.subr.mxu0 %v120_v47 }
 0x275   :  { %1011 = vmatpush3.msra.mxu1 %v108_v5  ;;  %1061 = vmatpush3.msra.mxu0 %v120_v47  ;;  %v119_v5 = vld [vmem:[#allocation10 + $0x88] sm:$0xff]  ;;  %v876_v47 = vld [vmem:[%s1442_s6 + $0x8] ss:$0 sm:$0xff]  ;;  %s879_s6 = sld [smem:[#allocation2 + $0x2]] }
 0x276   :  { %1012 = vmatprep.subr.mxu1 %v107_v6  ;;  %1062 = vmatprep.subr.mxu0 %v119_v5 }
 0x277   :  { %1013 = vmatpush3.msra.mxu1 %v107_v6  ;;  %1063 = vmatpush3.msra.mxu0 %v119_v5  ;;  %v118_v6 = vld [vmem:[#allocation10 + $0x80] sm:$0xff] }
 0x278   :  { %1014 = vmatprep.subr.mxu1 %v106_v7  ;;  %1064 = vmatprep.subr.mxu0 %v118_v6 }
 0x279   :  { %1015 = vmatpush3.msra.mxu1 %v106_v7  ;;  %1065 = vmatpush3.msra.mxu0 %v118_v6  ;;  %v357_v7 = vstv %s1394_s29 }
 0x27a   :  { %1016 = vmatprep.subr.mxu1 %v105_v8 }
 0x27b   :  { %1017 = vmatpush3.msra.mxu1 %v105_v8  ;;  %v553_v8 = vstv %s1396_s30 }
 0x27c   :  { %1018 = vmatprep.subr.mxu1 %v104_v9 }
 0x27d   :  { %1019 = vmatpush3.msra.mxu1 %v104_v9 }
 0x27e   :  { %1020 = vmatprep.subr.mxu1 %v103_v10 }
 0x27f   :  { %1021 = vmatpush3.msra.mxu1 %v103_v10 }
 0x280   :  { %1022 = vmatprep.subr.mxu1 %v102_v11 }
 0x281   :  { %1023 = vmatpush3.msra.mxu1 %v102_v11 }
 0x322   :  { %v1362_v12 = vpop.f32.mrf.mxu1 }
 0x324   :  { %v1364_v13 = vpop.f32.mrf.mxu1 }
 0x325   :  { %1024 = vmatprep.mubr.f32.mxu1 %v1364_v13 }
 0x326   :  { %1025 = vmatmul.mubr.f32.vlgmr.msra.gmra.mxu1 %v1362_v12 }
 0x327   :  { %1031 = vmatprep.mubr.msk.f32.mxu1 %vm274_vm1, %v1350_v38 }
 0x3e6   :  { %v1026_v16 = vpop.f32.mrf.mxu1 }
 0x3e7   :  { %v436_v17 = vadd.f32 %v1026_v16, %v363_v15 }
 0x3e8   :  { %v430_v18 = vpop.f32.mrf.mxu1 }
 0x3e9   :  { %v431_v20 = vadd.f32 %v430_v18, %v363_v15  ;;  %441 = vadd.xlane.f32.xlu0 %v436_v17  ;;  %v560_v15 = vsub.s32 6, %v1334_v19  ;;  %v1258_v19 = vmov 0.0  }
 0x3eb   :  { %439 = vadd.xlane.f32.xlu1 %v431_v20  ;;  %v561_v16 = vrot.slane %v1340_v21, %v560_v15  ;;  %v751_v21 = vstv %s879_s6 }
 0x472   :  { %v442_v22 = vpop.xlane.xlu0 %441 }
 0x473   :  { %v444_v23 = vmul.f32 0.03125, %v442_v22 }
 0x474   :  { %v440_v24 = vpop.xlane.xlu1 %439 }
 0x475   :  { %v1372_v25 = vsub.f32 %v436_v17, %v444_v23  ;;  %v443_v26 = vmul.f32 0.03125, %v440_v24 }
 0x477   :  { %v1374_v27 = vsub.f32 %v431_v20, %v443_v26  ;;  %v448_v29 = vmul.f32 %v1372_v25, %v1372_v25 }
 0x479   :  { %v450_v30 = vsel %vm136_vm0, %v448_v29, 0.0  ;;  %v447_v31 = vmul.f32 %v1374_v27, %v1374_v27 }
 0x47a   :  { %453 = vadd.xlane.f32.xlu0 %v450_v30 }
 0x47b   :  { %v449_v32 = vsel %vm136_vm0, %v447_v31, 0.0 }
 0x47c   :  { %451 = vadd.xlane.f32.xlu1 %v449_v32 }
 0x503   :  { %v454_v48 = vpop.xlane.xlu0 %453 }
 0x504   :  { %v456_v49 = vmul.f32 0.03125, %v454_v48 }
 0x505   :  { %v452_v50 = vpop.xlane.xlu1 %451 }
 0x506   :  { %v458_v51 = vadd.f32 1e-05, %v456_v49  ;;  %v455_v52 = vmul.f32 0.03125, %v452_v50 }
 0x508   :  { %1098 = vrsqrt.f32 %v458_v51  ;;  %v457_v53 = vadd.f32 1e-05, %v455_v52 }
 0x50a   :  { %1100 = vrsqrt.f32 %v457_v53 }
 0x515   :  { %v1099_v57 = vpop.eup %1098 }
 0x516   :  { %v466_v58 = vmul.f32 %v1099_v57, %v464_v55 }
 0x517   :  { %v1101_v61 = vpop.eup %1100 }
 0x518   :  { %v468_v62 = vmul.f32 %v466_v58, %v1372_v25  ;;  %v465_v63 = vmul.f32 %v1101_v61, %v464_v55  ;;  %v358_v58 = vmul.f32 %v357_v7, %v1364_v13 }
 0x51a   :  { %v474_v0 = vadd.f32 %v472_v60, %v468_v62  ;;  %v467_v1 = vmul.f32 %v465_v63, %v1374_v27 }
 0x51c   :  { %v476_v2 = vmax.f32 %v474_v0, 0.0  ;;  %v473_v3 = vadd.f32 %v472_v60, %v467_v1 }
 0x51e   :  { %1027 = vmatprep.subr.mxu1 %v476_v2  ;;  %v475_v4 = vmax.f32 %v473_v3, 0.0 }
 0x51f   :  { %1028 = vmatpush3.msra.mxu1 %v476_v2 }
 0x520   :  { %1029 = vmatprep.subr.mxu1 %v475_v4 }
 0x521   :  { %1030 = vmatpush3.msra.mxu1 %v475_v4 }
 0x522   :  { %1032 = vmatmul.mubr.msk.f32.vlgmr.msra.gmra.mxu1 %vm274_vm1, %v1358_v59 }
 0x523   :  { %1073 = vmatprep.mubr.msk.f32.mxu1 %vm274_vm1, %v1350_v38  ;;  %v359_v38 = vmul.f32 %v1362_v12, %v357_v7 }
 0x5e2   :  { %v1033_v9 = vpop.f32.mrf.mxu1 }
 0x5e3   :  { %v555_v10 = vmul.f32 %v1033_v9, %v553_v8 }
 0x5e4   :  { %v543_v11 = vpop.f32.mrf.mxu1 }
 0x5e5   :  { %1066 = vmatprep.mubr.f32.mxu0 %v543_v11  ;;  %v1405_v14 = vadd.f32 %v555_v10, %v359_v38  ;;  %v554_v55 = vmul.f32 %v553_v8, %v543_v11 }
 0x5e6   :  { %1067 = vmatmul.mubr.f32.vlgmr.msra.gmra.mxu0 %v1033_v9 }
 0x5e7   :  { %v556_v62 = vadd.f32 %v554_v55, %v358_v58 }
 0x6a6   :  { %v1068_v17 = vpop.f32.mrf.mxu0 }
 0x6a7   :  { %v634_v18 = vadd.f32 %v1068_v17, %v561_v16 }
 0x6a8   :  { %v628_v20 = vpop.f32.mrf.mxu0 }
 0x6a9   :  { %v629_v22 = vadd.f32 %v628_v20, %v561_v16  ;;  %639 = vadd.xlane.f32.xlu0 %v634_v18 }
 0x6ab   :  { %637 = vadd.xlane.f32.xlu1 %v629_v22 }
 0x732   :  { %v640_v23 = vpop.xlane.xlu0 %639 }
 0x733   :  { %v642_v24 = vmul.f32 0.03125, %v640_v23 }
 0x734   :  { %v638_v12 = vpop.xlane.xlu1 %637 }
 0x735   :  { %v644_v25 = vsub.f32 %v634_v18, %v642_v24  ;;  %v641_v26 = vmul.f32 0.03125, %v638_v12 }
 0x737   :  { %v643_v27 = vsub.f32 %v629_v22, %v641_v26  ;;  %v646_v29 = vmul.f32 %v644_v25, %v644_v25 }
 0x739   :  { %v648_v30 = vsel %vm136_vm0, %v646_v29, 0.0  ;;  %v645_v31 = vmul.f32 %v643_v27, %v643_v27 }
 0x73a   :  { %651 = vadd.xlane.f32.xlu0 %v648_v30 }
 0x73b   :  { %v647_v32 = vsel %vm136_vm0, %v645_v31, 0.0 }
 0x73c   :  { %649 = vadd.xlane.f32.xlu1 %v647_v32 }
 0x750   :  { %759 = vperm.xlu0 %1093, %v757_v33  }
 0x7c3   :  { %v652_v35 = vpop.xlane.xlu0 %651 }
 0x7c4   :  { %v654_v36 = vmul.f32 0.03125, %v652_v35 }
 0x7c5   :  { %v650_v37 = vpop.xlane.xlu1 %649 }
 0x7c6   :  { %v656_v39 = vadd.f32 1e-05, %v654_v36  ;;  %v653_v40 = vmul.f32 0.03125, %v650_v37 }
 0x7c8   :  { %1102 = vrsqrt.f32 %v656_v39  ;;  %v655_v41 = vadd.f32 1e-05, %v653_v40 }
 0x7ca   :  { %1104 = vrsqrt.f32 %v655_v41 }
 0x7cb   :  { %v760_v56 = vpop.permute.xlu0 %759 }
 0x7cc   :  { %vm761_vm3 = vcmp.eq.s32.totalorder %v760_v56, %v1343_v28 }
 0x7cd   :  { %v880_v1 = vsel %vm761_vm3, 1.0, %v1258_v19 }
 0x7d5   :  { %v1103_v44 = vpop.eup %1102 }
 0x7d6   :  { %v664_v45 = vmul.f32 %v1103_v44, %v662_v43 }
 0x7d7   :  { %v1105_v46 = vpop.eup %1104 }
 0x7d8   :  { %v666_v48 = vmul.f32 %v664_v45, %v644_v25  ;;  %v663_v49 = vmul.f32 %v1105_v46, %v662_v43 }
 0x7da   :  { %v672_v50 = vadd.f32 %v876_v47, %v666_v48  ;;  %v665_v51 = vmul.f32 %v663_v49, %v643_v27 }
 0x7dc   :  { %v674_v52 = vmax.f32 %v672_v50, 0.0  ;;  %v671_v53 = vadd.f32 %v876_v47, %v665_v51 }
 0x7de   :  { %1069 = vmatprep.subr.mxu1 %v674_v52  ;;  %v673_v54 = vmax.f32 %v671_v53, 0.0 }
 0x7df   :  { %1070 = vmatpush3.msra.mxu1 %v674_v52 }
 0x7e0   :  { %1071 = vmatprep.subr.mxu1 %v673_v54 }
 0x7e1   :  { %1072 = vmatpush3.msra.mxu1 %v673_v54 }
 0x7e2   :  { %1074 = vmatmul.mubr.msk.f32.vlgmr.msra.gmra.mxu1 %vm274_vm1, %v1358_v59  ;;  %1076 = vmatprep.subr.mxu1 %v1258_v19 }
 0x7e3   :  { %1078 = vmatprep.mubr.msk.f32.mxu1 %vm1259_vm2, %v1258_v19 }
 0x8a2   :  { %v1075_v57 = vpop.f32.mrf.mxu1 }
 0x8a3   :  { %v753_v60 = vmul.f32 %v1075_v57, %v751_v21 }
 0x8a4   :  { %v741_v61 = vpop.f32.mrf.mxu1 }
 0x8a5   :  { %v752_v63 = vmul.f32 %v751_v21, %v741_v61  ;;  %v755_v59 = vadd.f32 %v753_v60, %v1405_v14 }
 0x8a7   :  { %v754_v0 = vadd.f32 %v752_v63, %v556_v62  ;;  %756 = vst [vmem:[#allocation13] sm:$0xff] %v755_v59 }
 0x8a9   :  { %1077 = vmatpush3.msra.mxu1 %v754_v0 }
 0x8aa   :  { %1079 = vmatmul.mubr.msk.f32.vlgmr.msra.gmra.mxu1 %vm764_vm4, %v880_v1 }
 0x8ab   :  { %1209 = shalt.err (!%p1206_p1)
}
 0x8ac   :  { %858 = dma.vmem_to_hbm [thread:$0]  %s856_s13, 128, %s1444_s8, [#allocation14]  }
 0x8ad   :  { %s1261_s16 = smov [#allocation12]  }
 0x8ae   :  { %s845_s17 = sshll.u32 %s1261_s16, 4  ;;  %s846_s17 = int_to_ptr.vmem [resolvable:$true] %s845_s17 }
 0x8af   :  { %s1218_s18 = scalar_lea.vmem %s846_s17, 128  ;;  %p1223_p3 = scmp.lt.s32.totalorder %s846_s17, %s846_s17 }
 0x8b0   :  { %p1219_p2 = scmp.ne.s32.totalorder %s846_s17, %s1218_s18  ;;  %p1224_p4 = scmp.lt.s32.totalorder %s1218_s18, %s1218_s18 }
 0x8b2   :  { %p1225_p5 = por %p1224_p4, %p1223_p3 }
 0x8b4   :  { %p1226_p6 = pnand %p1225_p5, %p1219_p2 }
 0x96a   :  { %v834_v28 = vpop.f32.mrf.mxu1 }
 0x96b   :  { %838 = vst [vmem:[#allocation12] sm:$0xff] %v834_v28 }
 0x96c   :  { %v1080_v13 = vpop.f32.mrf.mxu1 }
 0x96d   :  { %1229 = shalt.err (!%p1226_p6)
}
 0x96e   :  { %848 = dma.vmem_to_hbm [thread:$0]  %s846_s17, 128, %s1443_s7, [#allocation4]  }
 0x96f   :  { %1246 = dma.done.wait [#allocation4], 128  }
 0x970   :  { %1247 = vsyncadd [#allocation4], 4294967168 }
 0x971   :  { %1248 = dma.done.wait [#allocation14], 128  }
 0x972   :  { %1249 = vsyncadd [#allocation14], 4294967168 }
 0x973   :  { %865 = vsyncpa [#allocation3], 1 }
 0x974   :  { %866 = vsyncpa [#allocation8], 1 }
 0x975   :  { %867 = vsyncpa [#allocation11], 1 }
 0x976   :  { %868 = vsyncpa [#allocation4], 1 }
 0x977   :  { %869 = vsyncpa [#allocation14], 1 }
 0x978   :  { %870 = vsyncpa [#allocation5], 1 }

</bundles_post_ra>
